<compile_context>
chip_gen: v5e
topology: v5e:2x2
jax: 0.10.0
libtpu: 0.0.40
codegen_flags: <defaults>
</compile_context>

<pallas_src>
import numpy as np
import jax
import jax.numpy as jnp
from jax.experimental import pallas as pl
from jax.experimental.pallas import tpu as pltpu


def _round_up(x, m):
    return ((x + m - 1) // m) * m


def _encoder_mlp_kernel(x_ref, *refs):
    """Fused MLP forward for one batch tile.

    x_ref      : VMEM [TB, D_in]   (flattened input tile, possibly bf16)
    refs[:-1]  : alternating (w_ref, b_ref) pairs, full-block VMEM residents
                 w_i : f32[in_i, out_i], b_i : f32[1, out_i]
    refs[-1]   : VMEM [TB, D_out]  output tile
    """
    out_ref = refs[-1]
    wb = refs[:-1]
    n_layers = len(wb) // 2

    h = x_ref[...].astype(jnp.float32)          # f32 math regardless of DMA dtype
    for i in range(n_layers):
        w = wb[2 * i][...]
        b = wb[2 * i + 1][...]
        h = jnp.dot(h, w, preferred_element_type=jnp.float32) + b
        if i < n_layers - 1:                    # no activation on the last layer
            h = jnp.maximum(h, 0.0)             # nn.ReLU
    out_ref[...] = h.astype(out_ref.dtype)


def _pick_batch_tile(B, D_in, D_out, in_itemsize, out_itemsize, const_bytes,
                     vmem_budget_bytes, max_tile_b):
    """VMEM-budget-aware batch-tile size with ragged last block + v7x split."""
    # Per-row live VMEM: double-buffered x tile, double-buffered output tile,
    # plus a rough allowance for the two live f32 hidden activations.
    bytes_per_row = (2 * D_in * in_itemsize
                     + 2 * D_out * out_itemsize
                     + 2 * 128 * 4)
    avail = max(vmem_budget_bytes - const_bytes, 1 << 20)
    tb = int(avail // bytes_per_row)
    tb = max(min(tb, max_tile_b), 8)
    tb = (tb // 8) * 8                          # sublane alignment

    if B <= tb:
        TB = B                                  # single full-dim block (always legal)
    else:
        TB = tb                                 # multiple of 8; last block ragged
    # v7x has 2 TensorCores: make sure the "parallel" batch axis has >= 2 steps.
    if B > 16 and pl.cdiv(B, TB) < 2:
        TB = _round_up(pl.cdiv(B, 2), 8)
    return TB


def encoder_mean_forward(x, weights, biases, *,
                         compute_dtype=jnp.bfloat16,
                         out_dtype=jnp.float32,
                         vmem_budget_bytes=12 * 1024 * 1024,
                         max_tile_b=1024,
                         single_buffer_consts=True):
    """Pallas implementation of EncoderMean.forward.

    Args:
        x:       (B, S, x_dim) float array.
        weights: list of matrices, weights[i] has shape (in_i, out_i)
                 (already transposed relative to torch.nn.Linear.weight).
        biases:  list of vectors, biases[i] has shape (out_i,).
        compute_dtype: dtype x is DMA'd in (bf16 default halves HBM read
                 traffic; math stays f32). Use jnp.float32 for exact semantics.
        out_dtype: dtype of the stored output (f32 default, matches PyTorch).

    Returns:
        (B, S, 1) out_dtype — the encoder mean (z_dimension == 1).
    """
    assert x.ndim == 3, "input must be (batch, sequence_length, x_dimension)"
    B, S, x_dim = x.shape
    D_in = S * x_dim
    D_out = S                                    # z_dimension == 1

    # Flatten (free reshape); cast only if the caller did not already hand us
    # compute_dtype data (ideally x arrives in bf16 from the producer).
    x_flat = x.reshape(B, D_in)
    if x_flat.dtype != compute_dtype:
        x_flat = x_flat.astype(compute_dtype)

    ws = [jnp.asarray(w, jnp.float32) for w in weights]
    bs = [jnp.asarray(b, jnp.float32).reshape(1, -1) for b in biases]
    n_layers = len(ws)
    assert n_layers >= 1 and len(bs) == n_layers

    in_itemsize = jnp.dtype(compute_dtype).itemsize
    out_itemsize = jnp.dtype(out_dtype).itemsize
    const_bytes = sum(int(np.prod(w.shape)) * 4 for w in ws) \
        + sum(int(np.prod(b.shape)) * 4 for b in bs)
    if not single_buffer_consts:
        const_bytes *= 2

    TB = _pick_batch_tile(B, D_in, D_out, in_itemsize, out_itemsize,
                          const_bytes, vmem_budget_bytes, max_tile_b)
    grid = (pl.cdiv(B, TB),)

    def _run(use_single_buffer):
        const_kwargs = {}
        if use_single_buffer:
            # Constant-index residents: no need to double-buffer them.
            const_kwargs = dict(pipeline_mode=pl.Buffered(1))

        in_specs = [pl.BlockSpec((TB, D_in), lambda i: (i, 0))]
        operands = [x_flat]
        for w, b in zip(ws, bs):
            in_specs.append(pl.BlockSpec(w.shape, lambda i: (0, 0),
                                         **const_kwargs))
            in_specs.append(pl.BlockSpec(b.shape, lambda i: (0, 0),
                                         **const_kwargs))
            operands.append(w)
            operands.append(b)

        return pl.pallas_call(
            _encoder_mlp_kernel,
            out_shape=jax.ShapeDtypeStruct((B, D_out), out_dtype),
            grid=grid,
            in_specs=in_specs,
            out_specs=pl.BlockSpec((TB, D_out), lambda i: (i, 0)),
            compiler_params=pltpu.CompilerParams(
                dimension_semantics=("parallel",)),   # megacore-shardable (v7x)
        )(*operands)

    if single_buffer_consts:
        try:
            out = _run(True)
        except Exception:
            # Fallback for JAX versions without BlockSpec(pipeline_mode=...).
            out = _run(False)
    else:
        out = _run(False)

    return out.reshape(B, S, 1)


def encoder_mean_ref(x, weights, biases):
    """Pure-JAX reference mirroring the PyTorch EncoderMean.forward."""
    B, S, x_dim = x.shape
    h = x.reshape(B, S * x_dim).astype(jnp.float32)
    for i, (w, b) in enumerate(zip(weights, biases)):
        h = h @ w + b
        if i < len(weights) - 1:
            h = jnp.maximum(h, 0.0)
    return h.reshape(B, S, 1)


def _make_params(key, D_in, D_out, n_layers, inter_dim):
    """Deterministic torch-style Linear params, pre-transposed to (in, out)."""
    dims = [D_in] + [inter_dim] * (n_layers - 1) + [D_out]
    keys = jax.random.split(key, 2 * n_layers)
    weights, biases = [], []
    for i in range(n_layers):
        bound = 1.0 / np.sqrt(dims[i])
        w = jax.random.uniform(keys[2 * i], (dims[i], dims[i + 1]),
                               dtype=jnp.float32, minval=-bound, maxval=bound)
        b = jax.random.uniform(keys[2 * i + 1], (dims[i + 1],),
                               dtype=jnp.float32, minval=-bound, maxval=bound)
        weights.append(w)
        biases.append(b)
    return weights, biases


if __name__ == "__main__":
    key = jax.random.PRNGKey(0)
    n_layers, inter_dim = 3, 128

    # --- small config matching the module defaults ---------------------------
    B, S, x_dim, z_dim = 2, 8, 1, 1
    k0, k1, k2, k3 = jax.random.split(key, 4)
    x = jax.random.normal(k0, (B, S, x_dim), dtype=jnp.float32)
    weights, biases = _make_params(k1, S * x_dim, S * z_dim, n_layers, inter_dim)
    ref = encoder_mean_ref(x, weights, biases)

    # Exact path (f32 end-to-end): must match the PyTorch semantics tightly.
    out_f32 = jax.block_until_ready(
        encoder_mean_forward(x, weights, biases, compute_dtype=jnp.float32))
    np.testing.assert_allclose(np.asarray(out_f32), np.asarray(ref),
                               rtol=1e-5, atol=1e-5)
    assert out_f32.shape == (B, S, z_dim)

    # Default performance path (bf16 input DMA, f32 accumulation).
    out_bf16 = jax.block_until_ready(encoder_mean_forward(x, weights, biases))
    np.testing.assert_allclose(np.asarray(out_bf16), np.asarray(ref),
                               rtol=3e-2, atol=3e-2)

    # --- larger config: exercises multi-step grid + ragged last batch block --
    B2, S2, xd2 = 300, 16, 2
    x2 = jax.random.normal(k2, (B2, S2, xd2), dtype=jnp.float32)
    w2, b2 = _make_params(k3, S2 * xd2, S2, n_layers, inter_dim)
    ref2 = encoder_mean_ref(x2, w2, b2)
    out2 = jax.block_until_ready(
        encoder_mean_forward(x2, w2, b2, compute_dtype=jnp.float32))
    np.testing.assert_allclose(np.asarray(out2), np.asarray(ref2),
                               rtol=1e-5, atol=1e-5)
    assert out2.shape == (B2, S2, 1)

    print("KERNEL_OK")
</pallas_src>

<mosaic_0001>
module attributes {stable_mosaic.version = 11 : i64} {
  func.func @_encoder_mlp_kernel(%arg0: i32, %arg1: memref<2x8xf32, #tpu.memory_space<vmem>>, %arg2: memref<8x128xf32, #tpu.memory_space<vmem>>, %arg3: memref<1x128xf32, #tpu.memory_space<vmem>>, %arg4: memref<128x128xf32, #tpu.memory_space<vmem>>, %arg5: memref<1x128xf32, #tpu.memory_space<vmem>>, %arg6: memref<128x8xf32, #tpu.memory_space<vmem>>, %arg7: memref<1x8xf32, #tpu.memory_space<vmem>>, %arg8: memref<2x8xf32, #tpu.memory_space<vmem>>) attributes {dimension_semantics = [#tpu.dimension_semantics<parallel>], iteration_bounds = array<i64: 1>, scalar_prefetch = 0 : i64, scratch_operands = 0 : i64, tpu.core_type = #tpu.core_type<tc>, window_params = [{transform_indices = @transform_0, window_bounds = array<i64: 2, 8>}, {pipeline_mode = #tpu.pipeline_mode<synchronous>, transform_indices = @transform_1, window_bounds = array<i64: 8, 128>}, {pipeline_mode = #tpu.pipeline_mode<synchronous>, transform_indices = @transform_2, window_bounds = array<i64: 1, 128>}, {pipeline_mode = #tpu.pipeline_mode<synchronous>, transform_indices = @transform_3, window_bounds = array<i64: 128, 128>}, {pipeline_mode = #tpu.pipeline_mode<synchronous>, transform_indices = @transform_4, window_bounds = array<i64: 1, 128>}, {pipeline_mode = #tpu.pipeline_mode<synchronous>, transform_indices = @transform_5, window_bounds = array<i64: 128, 8>}, {pipeline_mode = #tpu.pipeline_mode<synchronous>, transform_indices = @transform_6, window_bounds = array<i64: 1, 8>}, {transform_indices = @transform_7, window_bounds = array<i64: 2, 8>}]} {
    %c0 = arith.constant 0 : index
    %c0_0 = arith.constant 0 : index
    %0 = vector.load %arg1[%c0, %c0_0] : memref<2x8xf32, #tpu.memory_space<vmem>>, vector<2x8xf32>
    %c0_1 = arith.constant 0 : index
    %c0_2 = arith.constant 0 : index
    %1 = vector.load %arg2[%c0_1, %c0_2] : memref<8x128xf32, #tpu.memory_space<vmem>>, vector<8x128xf32>
    %c0_3 = arith.constant 0 : index
    %c0_4 = arith.constant 0 : index
    %2 = vector.load %arg3[%c0_3, %c0_4] : memref<1x128xf32, #tpu.memory_space<vmem>>, vector<1x128xf32>
    %cst = arith.constant dense<0.000000e+00> : vector<2x128xf32>
    %3 = tpu.matmul %0, %1, %cst {dimension_numbers = #tpu.dot_dimension_numbers<[1], [0], [0], [1], [0, 0, 1, 1], [], []>} : vector<2x8xf32>, vector<8x128xf32>, vector<2x128xf32> -> vector<2x128xf32>
    %4 = vector.broadcast %2 : vector<1x128xf32> to vector<2x128xf32>
    %5 = arith.addf %3, %4 : vector<2x128xf32>
    %cst_5 = arith.constant 0.000000e+00 : f32
    %6 = vector.broadcast %cst_5 : f32 to vector<2x128xf32>
    %7 = arith.maximumf %5, %6 : vector<2x128xf32>
    %c0_6 = arith.constant 0 : index
    %c0_7 = arith.constant 0 : index
    %8 = vector.load %arg4[%c0_6, %c0_7] : memref<128x128xf32, #tpu.memory_space<vmem>>, vector<128x128xf32>
    %c0_8 = arith.constant 0 : index
    %c0_9 = arith.constant 0 : index
    %9 = vector.load %arg5[%c0_8, %c0_9] : memref<1x128xf32, #tpu.memory_space<vmem>>, vector<1x128xf32>
    %cst_10 = arith.constant dense<0.000000e+00> : vector<2x128xf32>
    %10 = tpu.matmul %7, %8, %cst_10 {dimension_numbers = #tpu.dot_dimension_numbers<[1], [0], [0], [1], [0, 0, 1, 1], [], []>} : vector<2x128xf32>, vector<128x128xf32>, vector<2x128xf32> -> vector<2x128xf32>
    %11 = vector.broadcast %9 : vector<1x128xf32> to vector<2x128xf32>
    %12 = arith.addf %10, %11 : vector<2x128xf32>
    %cst_11 = arith.constant 0.000000e+00 : f32
    %13 = vector.broadcast %cst_11 : f32 to vector<2x128xf32>
    %14 = arith.maximumf %12, %13 : vector<2x128xf32>
    %c0_12 = arith.constant 0 : index
    %c0_13 = arith.constant 0 : index
    %15 = vector.load %arg6[%c0_12, %c0_13] : memref<128x8xf32, #tpu.memory_space<vmem>>, vector<128x8xf32>
    %c0_14 = arith.constant 0 : index
    %c0_15 = arith.constant 0 : index
    %16 = vector.load %arg7[%c0_14, %c0_15] : memref<1x8xf32, #tpu.memory_space<vmem>>, vector<1x8xf32>
    %cst_16 = arith.constant dense<0.000000e+00> : vector<2x8xf32>
    %17 = tpu.matmul %14, %15, %cst_16 {dimension_numbers = #tpu.dot_dimension_numbers<[1], [0], [0], [1], [0, 0, 1, 1], [], []>} : vector<2x128xf32>, vector<128x8xf32>, vector<2x8xf32> -> vector<2x8xf32>
    %18 = vector.broadcast %16 : vector<1x8xf32> to vector<2x8xf32>
    %19 = arith.addf %17, %18 : vector<2x8xf32>
    %c0_17 = arith.constant 0 : index
    %c0_18 = arith.constant 0 : index
    %20 = vector.load %arg8[%c0_17, %c0_18] : memref<2x8xf32, #tpu.memory_space<vmem>>, vector<2x8xf32>
    tpu.vector_store %arg8[%c0_17, %c0_18], %19 {strides = array<i32>} : memref<2x8xf32, #tpu.memory_space<vmem>>, vector<2x8xf32>,
    return
  }
  func.func @transform_0(%arg0: i32) -> (i32, i32) {
    %c0_i32 = arith.constant 0 : i32
    %c0_i32_0 = arith.constant 0 : i32
    return %arg0, %c0_i32 : i32, i32
  }
  func.func @transform_1(%arg0: i32) -> (i32, i32) {
    %c0_i32 = arith.constant 0 : i32
    %c0_i32_0 = arith.constant 0 : i32
    %c0_i32_1 = arith.constant 0 : i32
    return %c0_i32, %c0_i32_0 : i32, i32
  }
  func.func @transform_2(%arg0: i32) -> (i32, i32) {
    %c0_i32 = arith.constant 0 : i32
    %c0_i32_0 = arith.constant 0 : i32
    %c0_i32_1 = arith.constant 0 : i32
    return %c0_i32, %c0_i32_0 : i32, i32
  }
  func.func @transform_3(%arg0: i32) -> (i32, i32) {
    %c0_i32 = arith.constant 0 : i32
    %c0_i32_0 = arith.constant 0 : i32
    %c0_i32_1 = arith.constant 0 : i32
    return %c0_i32, %c0_i32_0 : i32, i32
  }
  func.func @transform_4(%arg0: i32) -> (i32, i32) {
    %c0_i32 = arith.constant 0 : i32
    %c0_i32_0 = arith.constant 0 : i32
    %c0_i32_1 = arith.constant 0 : i32
    return %c0_i32, %c0_i32_0 : i32, i32
  }
  func.func @transform_5(%arg0: i32) -> (i32, i32) {
    %c0_i32 = arith.constant 0 : i32
    %c0_i32_0 = arith.constant 0 : i32
    %c0_i32_1 = arith.constant 0 : i32
    return %c0_i32, %c0_i32_0 : i32, i32
  }
  func.func @transform_6(%arg0: i32) -> (i32, i32) {
    %c0_i32 = arith.constant 0 : i32
    %c0_i32_0 = arith.constant 0 : i32
    %c0_i32_1 = arith.constant 0 : i32
    return %c0_i32, %c0_i32_0 : i32, i32
  }
  func.func @transform_7(%arg0: i32) -> (i32, i32) {
    %c0_i32 = arith.constant 0 : i32
    %c0_i32_0 = arith.constant 0 : i32
    return %arg0, %c0_i32 : i32, i32
  }
}

module attributes {stable_mosaic.version = 11 : i64} {
  func.func @_encoder_mlp_kernel(%arg0: i32, %arg1: memref<2x8xf32, #tpu.memory_space<vmem>>, %arg2: memref<8x128xf32, #tpu.memory_space<vmem>>, %arg3: memref<1x128xf32, #tpu.memory_space<vmem>>, %arg4: memref<128x128xf32, #tpu.memory_space<vmem>>, %arg5: memref<1x128xf32, #tpu.memory_space<vmem>>, %arg6: memref<128x8xf32, #tpu.memory_space<vmem>>, %arg7: memref<1x8xf32, #tpu.memory_space<vmem>>, %arg8: memref<2x8xf32, #tpu.memory_space<vmem>>) attributes {dimension_semantics = [#tpu.dimension_semantics<parallel>], iteration_bounds = array<i64: 1>, scalar_prefetch = 0 : i64, scratch_operands = 0 : i64, tpu.core_type = #tpu.core_type<tc>, window_params = [{transform_indices = @transform_0, window_bounds = array<i64: 2, 8>}, {pipeline_mode = #tpu.pipeline_mode<synchronous>, transform_indices = @transform_1, window_bounds = array<i64: 8, 128>}, {pipeline_mode = #tpu.pipeline_mode<synchronous>, transform_indices = @transform_2, window_bounds = array<i64: 1, 128>}, {pipeline_mode = #tpu.pipeline_mode<synchronous>, transform_indices = @transform_3, window_bounds = array<i64: 128, 128>}, {pipeline_mode = #tpu.pipeline_mode<synchronous>, transform_indices = @transform_4, window_bounds = array<i64: 1, 128>}, {pipeline_mode = #tpu.pipeline_mode<synchronous>, transform_indices = @transform_5, window_bounds = array<i64: 128, 8>}, {pipeline_mode = #tpu.pipeline_mode<synchronous>, transform_indices = @transform_6, window_bounds = array<i64: 1, 8>}, {transform_indices = @transform_7, window_bounds = array<i64: 2, 8>}]} {
    %c0 = arith.constant 0 : index
    %c0_0 = arith.constant 0 : index
    %0 = vector.load %arg1[%c0, %c0_0] : memref<2x8xf32, #tpu.memory_space<vmem>>, vector<2x8xf32>
    %c0_1 = arith.constant 0 : index
    %c0_2 = arith.constant 0 : index
    %1 = vector.load %arg2[%c0_1, %c0_2] : memref<8x128xf32, #tpu.memory_space<vmem>>, vector<8x128xf32>
    %c0_3 = arith.constant 0 : index
    %c0_4 = arith.constant 0 : index
    %2 = vector.load %arg3[%c0_3, %c0_4] : memref<1x128xf32, #tpu.memory_space<vmem>>, vector<1x128xf32>
    %cst = arith.constant dense<0.000000e+00> : vector<2x128xf32>
    %3 = tpu.matmul %0, %1, %cst {dimension_numbers = #tpu.dot_dimension_numbers<[1], [0], [0], [1], [0, 0, 1, 1], [], []>} : vector<2x8xf32>, vector<8x128xf32>, vector<2x128xf32> -> vector<2x128xf32>
    %4 = vector.broadcast %2 : vector<1x128xf32> to vector<2x128xf32>
    %5 = arith.addf %3, %4 : vector<2x128xf32>
    %cst_5 = arith.constant 0.000000e+00 : f32
    %6 = vector.broadcast %cst_5 : f32 to vector<2x128xf32>
    %7 = arith.maximumf %5, %6 : vector<2x128xf32>
    %c0_6 = arith.constant 0 : index
    %c0_7 = arith.constant 0 : index
    %8 = vector.load %arg4[%c0_6, %c0_7] : memref<128x128xf32, #tpu.memory_space<vmem>>, vector<128x128xf32>
    %c0_8 = arith.constant 0 : index
    %c0_9 = arith.constant 0 : index
    %9 = vector.load %arg5[%c0_8, %c0_9] : memref<1x128xf32, #tpu.memory_space<vmem>>, vector<1x128xf32>
    %cst_10 = arith.constant dense<0.000000e+00> : vector<2x128xf32>
    %10 = tpu.matmul %7, %8, %cst_10 {dimension_numbers = #tpu.dot_dimension_numbers<[1], [0], [0], [1], [0, 0, 1, 1], [], []>} : vector<2x128xf32>, vector<128x128xf32>, vector<2x128xf32> -> vector<2x128xf32>
    %11 = vector.broadcast %9 : vector<1x128xf32> to vector<2x128xf32>
    %12 = arith.addf %10, %11 : vector<2x128xf32>
    %cst_11 = arith.constant 0.000000e+00 : f32
    %13 = vector.broadcast %cst_11 : f32 to vector<2x128xf32>
    %14 = arith.maximumf %12, %13 : vector<2x128xf32>
    %c0_12 = arith.constant 0 : index
    %c0_13 = arith.constant 0 : index
    %15 = vector.load %arg6[%c0_12, %c0_13] : memref<128x8xf32, #tpu.memory_space<vmem>>, vector<128x8xf32>
    %c0_14 = arith.constant 0 : index
    %c0_15 = arith.constant 0 : index
    %16 = vector.load %arg7[%c0_14, %c0_15] : memref<1x8xf32, #tpu.memory_space<vmem>>, vector<1x8xf32>
    %cst_16 = arith.constant dense<0.000000e+00> : vector<2x8xf32>
    %17 = tpu.matmul %14, %15, %cst_16 {dimension_numbers = #tpu.dot_dimension_numbers<[1], [0], [0], [1], [0, 0, 1, 1], [], []>} : vector<2x128xf32>, vector<128x8xf32>, vector<2x8xf32> -> vector<2x8xf32>
    %18 = vector.broadcast %16 : vector<1x8xf32> to vector<2x8xf32>
    %19 = arith.addf %17, %18 : vector<2x8xf32>
    %c0_17 = arith.constant 0 : index
    %c0_18 = arith.constant 0 : index
    %20 = vector.load %arg8[%c0_17, %c0_18] : memref<2x8xf32, #tpu.memory_space<vmem>>, vector<2x8xf32>
    tpu.vector_store %arg8[%c0_17, %c0_18], %19 {strides = array<i32>} : memref<2x8xf32, #tpu.memory_space<vmem>>, vector<2x8xf32>,
    return
  }
  func.func @transform_0(%arg0: i32) -> (i32, i32) {
    %c0_i32 = arith.constant 0 : i32
    %c0_i32_0 = arith.constant 0 : i32
    return %arg0, %c0_i32 : i32, i32
  }
  func.func @transform_1(%arg0: i32) -> (i32, i32) {
    %c0_i32 = arith.constant 0 : i32
    %c0_i32_0 = arith.constant 0 : i32
    %c0_i32_1 = arith.constant 0 : i32
    return %c0_i32, %c0_i32_0 : i32, i32
  }
  func.func @transform_2(%arg0: i32) -> (i32, i32) {
    %c0_i32 = arith.constant 0 : i32
    %c0_i32_0 = arith.constant 0 : i32
    %c0_i32_1 = arith.constant 0 : i32
    return %c0_i32, %c0_i32_0 : i32, i32
  }
  func.func @transform_3(%arg0: i32) -> (i32, i32) {
    %c0_i32 = arith.constant 0 : i32
    %c0_i32_0 = arith.constant 0 : i32
    %c0_i32_1 = arith.constant 0 : i32
    return %c0_i32, %c0_i32_0 : i32, i32
  }
  func.func @transform_4(%arg0: i32) -> (i32, i32) {
    %c0_i32 = arith.constant 0 : i32
    %c0_i32_0 = arith.constant 0 : i32
    %c0_i32_1 = arith.constant 0 : i32
    return %c0_i32, %c0_i32_0 : i32, i32
  }
  func.func @transform_5(%arg0: i32) -> (i32, i32) {
    %c0_i32 = arith.constant 0 : i32
    %c0_i32_0 = arith.constant 0 : i32
    %c0_i32_1 = arith.constant 0 : i32
    return %c0_i32, %c0_i32_0 : i32, i32
  }
  func.func @transform_6(%arg0: i32) -> (i32, i32) {
    %c0_i32 = arith.constant 0 : i32
    %c0_i32_0 = arith.constant 0 : i32
    %c0_i32_1 = arith.constant 0 : i32
    return %c0_i32, %c0_i32_0 : i32, i32
  }
  func.func @transform_7(%arg0: i32) -> (i32, i32) {
    %c0_i32 = arith.constant 0 : i32
    %c0_i32_0 = arith.constant 0 : i32
    return %arg0, %c0_i32 : i32, i32
  }
}

</mosaic_0001>

<bundles_post_ra>
// kernel: tpu_custom_call.1
= control target key start
LH: loop header
LB: loop body
LE: loop exit
PB: predicated region body
PF: predicated region fallthrough
CT: control target
= control target key end

     0   :  { %12 = vsyncpa [#allocation3], 0  ;;  %s386_s0 = inlined_call_operand.vmem [shape: f32[2,8], index: 0, kind: input, shape index: {}]   ;;  %s387_s1 = inlined_call_operand.vmem [shape: f32[8,128], index: 1, kind: input, shape index: {}]   ;;  %s388_s2 = inlined_call_operand.hbm [shape: f32[1,128], index: 2, kind: input, shape index: {}]   ;;  %s389_s3 = inlined_call_operand.vmem [shape: f32[128,128], index: 3, kind: input, shape index: {}]   ;;  %s390_s4 = inlined_call_operand.vmem [shape: f32[1,128], index: 4, kind: input, shape index: {}]   ;;  %s391_s5 = inlined_call_operand.vmem [shape: f32[128,8], index: 5, kind: input, shape index: {}]   ;;  %s392_s6 = inlined_call_operand.vmem [shape: f32[1,8], index: 6, kind: input, shape index: {}]   ;;  %s393_s7 = inlined_call_operand.hbm [shape: f32[2,8], index: 7, kind: output, shape index: {}]  }
   0x1   :  { %13 = vsyncpa [#allocation4], 0  ;;  %s23_s26 = sshll.u32 %s388_s2, 4  ;;  %s230_s27 = smov [#allocation2]   ;;  %s24_s26 = int_to_ptr.hbm [resolvable:$true] %s23_s26 }
   0x2   :  { %s25_s28 = sshll.u32 %s230_s27, 4  ;;  %s26_s28 = int_to_ptr.vmem [resolvable:$true] %s25_s28 }
   0x3   :  { %28 = dma.hbm_to_vmem [thread:$0]  %s24_s26, 16, %s26_s28, [#allocation3]  }
   0x4   :  { %226 = dma.done.wait [#allocation3], 16  }
   0x5   :  { %227 = vsyncadd [#allocation3], 4294967280  ;;  %vm47_vm0 = vcmask 64512   ;;  %v42_v0 = vld [vmem:[%s387_s1] sm:$0xff]  ;;  %v87_v2 = vld [vmem:[%s389_s3 + $0x78] sm:$0xff]  ;;  %s231_s21 = smov [#allocation5]  }
   0x6   :  { %v41_v1 = vld [vmem:[%s386_s0] sm:$0x3]  ;;  %66 = vmatpush.msra.mxu0 %v42_v0  ;;  %92 = vmatpush.msra.mxu1 %v87_v2  ;;  %v86_v3 = vld [vmem:[%s389_s3 + $0x70] sm:$0xff]  ;;  %v85_v4 = vld [vmem:[%s389_s3 + $0x68] sm:$0xff]  ;;  %s160_s22 = sshll.u32 %s231_s21, 4  ;;  %s162_s25 = sshll.u32 %s393_s7, 4  ;;  %s161_s22 = int_to_ptr.vmem [resolvable:$true] %s160_s22  ;;  %s163_s25 = int_to_ptr.hbm [resolvable:$true] %s162_s25 }
   0x7   :  { %172 = vmatmul.msk.f32.vlgmr.msra.gmra.mxu0 %vm47_vm0, %v41_v1  ;;  %v84_v5 = vld [vmem:[%s389_s3 + $0x60] sm:$0xff]  ;;  %v83_v6 = vld [vmem:[%s389_s3 + $0x58] sm:$0xff]  ;;  %v82_v7 = vld [vmem:[%s389_s3 + $0x50] sm:$0xff]  ;;  %vm153_vm1 = vcmask 58368  }
   0x8   :  { %93 = vmatpush.msra.mxu1 %v86_v3  ;;  %v81_v8 = vld [vmem:[%s389_s3 + $0x48] sm:$0xff]  ;;  %v80_v9 = vld [vmem:[%s389_s3 + $0x40] sm:$0xff]  ;;  %v79_v10 = vld [vmem:[%s389_s3 + $0x38] sm:$0xff] }
   0x9   :  { %v78_v11 = vld [vmem:[%s389_s3 + $0x30] sm:$0xff]  ;;  %v77_v12 = vld [vmem:[%s389_s3 + $0x28] sm:$0xff]  ;;  %v76_v13 = vld [vmem:[%s389_s3 + $0x20] sm:$0xff] }
   0xa   :  { %94 = vmatpush.msra.mxu1 %v85_v4  ;;  %v75_v14 = vld [vmem:[%s389_s3 + $0x18] sm:$0xff]  ;;  %v74_v15 = vld [vmem:[%s389_s3 + $0x10] sm:$0xff]  ;;  %v73_v16 = vld [vmem:[%s389_s3 + $0x8] sm:$0xff] }
   0xb   :  { %v72_v17 = vld [vmem:[%s389_s3] sm:$0xff]  ;;  %v128_v18 = vld [vmem:[%s391_s5 + $0x78] sm:$0xff]  ;;  %v127_v19 = vld [vmem:[%s391_s5 + $0x70] sm:$0xff] }
   0xc   :  { %95 = vmatpush.msra.mxu1 %v84_v5  ;;  %133 = vmatpush.msra.mxu2 %v128_v18  ;;  %v126_v20 = vld [vmem:[%s391_s5 + $0x68] sm:$0xff]  ;;  %v125_v21 = vld [vmem:[%s391_s5 + $0x60] sm:$0xff]  ;;  %v124_v22 = vld [vmem:[%s391_s5 + $0x58] sm:$0xff] }
   0xd   :  { %v123_v23 = vld [vmem:[%s391_s5 + $0x50] sm:$0xff]  ;;  %v122_v24 = vld [vmem:[%s391_s5 + $0x48] sm:$0xff]  ;;  %v121_v25 = vld [vmem:[%s391_s5 + $0x40] sm:$0xff] }
   0xe   :  { %96 = vmatpush.msra.mxu1 %v83_v6  ;;  %134 = vmatpush.msra.mxu2 %v127_v19  ;;  %v120_v26 = vld [vmem:[%s391_s5 + $0x38] sm:$0xff]  ;;  %v119_v27 = vld [vmem:[%s391_s5 + $0x30] sm:$0xff]  ;;  %v118_v28 = vld [vmem:[%s391_s5 + $0x28] sm:$0xff] }
   0xf   :  { %v117_v29 = vld [vmem:[%s391_s5 + $0x20] sm:$0xff]  ;;  %v116_v30 = vld [vmem:[%s391_s5 + $0x18] sm:$0xff]  ;;  %v115_v35 = vld [vmem:[%s391_s5 + $0x10] sm:$0xff] }
  0x10   :  { %97 = vmatpush.msra.mxu1 %v82_v7  ;;  %135 = vmatpush.msra.mxu2 %v126_v20  ;;  %v175_v31 = vld [vmem:[#allocation2] ss:$0 sm:$0xff]  ;;  %v114_v36 = vld [vmem:[%s391_s5 + $0x8] sm:$0xff] }
  0x11   :  { %v113_v37 = vld [vmem:[%s391_s5] sm:$0xff] }
  0x12   :  { %98 = vmatpush.msra.mxu1 %v81_v8  ;;  %136 = vmatpush.msra.mxu2 %v125_v21  ;;  %v176_v38 = vld [vmem:[%s390_s4] ss:$0 sm:$0xff] }
  0x13   :  { %v177_v42 = vld [vmem:[%s392_s6] ss:$0 sm:$0xff] }
  0x14   :  { %99 = vmatpush.msra.mxu1 %v80_v9  ;;  %137 = vmatpush.msra.mxu2 %v124_v22 }
  0x16   :  { %100 = vmatpush.msra.mxu1 %v79_v10  ;;  %138 = vmatpush.msra.mxu2 %v123_v23 }
  0x18   :  { %101 = vmatpush.msra.mxu1 %v78_v11  ;;  %139 = vmatpush.msra.mxu2 %v122_v24 }
  0x1a   :  { %102 = vmatpush.msra.mxu1 %v77_v12  ;;  %140 = vmatpush.msra.mxu2 %v121_v25 }
  0x1c   :  { %103 = vmatpush.msra.mxu1 %v76_v13  ;;  %141 = vmatpush.msra.mxu2 %v120_v26 }
  0x1e   :  { %104 = vmatpush.msra.mxu1 %v75_v14  ;;  %142 = vmatpush.msra.mxu2 %v119_v27 }
  0x20   :  { %105 = vmatpush.msra.mxu1 %v74_v15  ;;  %143 = vmatpush.msra.mxu2 %v118_v28 }
  0x22   :  { %106 = vmatpush.msra.mxu1 %v73_v16  ;;  %144 = vmatpush.msra.mxu2 %v117_v29 }
  0x24   :  { %107 = vmatpush.msra.mxu1 %v72_v17  ;;  %145 = vmatpush.msra.mxu2 %v116_v30 }
  0x26   :  { %146 = vmatpush.msra.mxu2 %v115_v35 }
  0x28   :  { %147 = vmatpush.msra.mxu2 %v114_v36 }
  0x2a   :  { %148 = vmatpush.msra.mxu2 %v113_v37 }
  0x84   :  { %v68_v32 = vpop.f32.mrf.mxu0 }
  0x85   :  { %v69_v33 = vadd.f32 %v175_v31, %v68_v32 }
  0x87   :  { %v71_v34 = vmax.f32 %v69_v33, 0.0 }
  0x89   :  { %108 = vmatmul.f32.vlgmr.msra.gmra.mxu1 %v71_v34 }
 0x106   :  { %v109_v39 = vpop.f32.mrf.mxu1 }
 0x107   :  { %v110_v40 = vadd.f32 %v176_v38, %v109_v39 }
 0x109   :  { %v112_v41 = vmax.f32 %v110_v40, 0.0 }
 0x10b   :  { %149 = vmatmul.f32.vlgmr.msra.gmra.mxu2 %v112_v41 }
 0x18e   :  { %v150_v43 = vpop.f32.mrf.mxu2 }
 0x18f   :  { %v151_v44 = vadd.f32 %v177_v42, %v150_v43 }
 0x191   :  { %154 = vst.msk [vmem:[#allocation5] sm:$0x3] %vm153_vm1, %v151_v44 }
 0x192   :  { %165 = dma.vmem_to_hbm [thread:$0]  %s161_s22, 32, %s163_s25, [#allocation4]  }
 0x193   :  { %228 = dma.done.wait [#allocation4], 32  }
 0x194   :  { %229 = vsyncadd [#allocation4], 4294967264 }
 0x195   :  { %170 = vsyncpa [#allocation3], 1 }
 0x196   :  { %171 = vsyncpa [#allocation4], 1 }

// kernel: tpu_custom_call.1
= control target key start
LH: loop header
LB: loop body
LE: loop exit
PB: predicated region body
PF: predicated region fallthrough
CT: control target
= control target key end

     0   :  { %12 = vsyncpa [#allocation3], 0  ;;  %s386_s0 = inlined_call_operand.vmem [shape: f32[2,8], index: 0, kind: input, shape index: {}]   ;;  %s387_s1 = inlined_call_operand.vmem [shape: f32[8,128], index: 1, kind: input, shape index: {}]   ;;  %s388_s2 = inlined_call_operand.hbm [shape: f32[1,128], index: 2, kind: input, shape index: {}]   ;;  %s389_s3 = inlined_call_operand.vmem [shape: f32[128,128], index: 3, kind: input, shape index: {}]   ;;  %s390_s4 = inlined_call_operand.vmem [shape: f32[1,128], index: 4, kind: input, shape index: {}]   ;;  %s391_s5 = inlined_call_operand.vmem [shape: f32[128,8], index: 5, kind: input, shape index: {}]   ;;  %s392_s6 = inlined_call_operand.vmem [shape: f32[1,8], index: 6, kind: input, shape index: {}]   ;;  %s393_s7 = inlined_call_operand.hbm [shape: f32[2,8], index: 7, kind: output, shape index: {}]  }
   0x1   :  { %13 = vsyncpa [#allocation4], 0  ;;  %s23_s26 = sshll.u32 %s388_s2, 4  ;;  %s230_s27 = smov [#allocation2]   ;;  %s24_s26 = int_to_ptr.hbm [resolvable:$true] %s23_s26 }
   0x2   :  { %s25_s28 = sshll.u32 %s230_s27, 4  ;;  %s26_s28 = int_to_ptr.vmem [resolvable:$true] %s25_s28 }
   0x3   :  { %28 = dma.hbm_to_vmem [thread:$0]  %s24_s26, 16, %s26_s28, [#allocation3]  }
   0x4   :  { %226 = dma.done.wait [#allocation3], 16  }
   0x5   :  { %227 = vsyncadd [#allocation3], 4294967280  ;;  %vm47_vm0 = vcmask 64512   ;;  %v42_v0 = vld [vmem:[%s387_s1] sm:$0xff]  ;;  %v87_v2 = vld [vmem:[%s389_s3 + $0x78] sm:$0xff]  ;;  %s231_s21 = smov [#allocation5]  }
   0x6   :  { %v41_v1 = vld [vmem:[%s386_s0] sm:$0x3]  ;;  %66 = vmatpush.msra.mxu0 %v42_v0  ;;  %92 = vmatpush.msra.mxu1 %v87_v2  ;;  %v86_v3 = vld [vmem:[%s389_s3 + $0x70] sm:$0xff]  ;;  %v85_v4 = vld [vmem:[%s389_s3 + $0x68] sm:$0xff]  ;;  %s160_s22 = sshll.u32 %s231_s21, 4  ;;  %s162_s25 = sshll.u32 %s393_s7, 4  ;;  %s161_s22 = int_to_ptr.vmem [resolvable:$true] %s160_s22  ;;  %s163_s25 = int_to_ptr.hbm [resolvable:$true] %s162_s25 }
   0x7   :  { %172 = vmatmul.msk.f32.vlgmr.msra.gmra.mxu0 %vm47_vm0, %v41_v1  ;;  %v84_v5 = vld [vmem:[%s389_s3 + $0x60] sm:$0xff]  ;;  %v83_v6 = vld [vmem:[%s389_s3 + $0x58] sm:$0xff]  ;;  %v82_v7 = vld [vmem:[%s389_s3 + $0x50] sm:$0xff]  ;;  %vm153_vm1 = vcmask 58368  }
   0x8   :  { %93 = vmatpush.msra.mxu1 %v86_v3  ;;  %v81_v8 = vld [vmem:[%s389_s3 + $0x48] sm:$0xff]  ;;  %v80_v9 = vld [vmem:[%s389_s3 + $0x40] sm:$0xff]  ;;  %v79_v10 = vld [vmem:[%s389_s3 + $0x38] sm:$0xff] }
   0x9   :  { %v78_v11 = vld [vmem:[%s389_s3 + $0x30] sm:$0xff]  ;;  %v77_v12 = vld [vmem:[%s389_s3 + $0x28] sm:$0xff]  ;;  %v76_v13 = vld [vmem:[%s389_s3 + $0x20] sm:$0xff] }
   0xa   :  { %94 = vmatpush.msra.mxu1 %v85_v4  ;;  %v75_v14 = vld [vmem:[%s389_s3 + $0x18] sm:$0xff]  ;;  %v74_v15 = vld [vmem:[%s389_s3 + $0x10] sm:$0xff]  ;;  %v73_v16 = vld [vmem:[%s389_s3 + $0x8] sm:$0xff] }
   0xb   :  { %v72_v17 = vld [vmem:[%s389_s3] sm:$0xff]  ;;  %v128_v18 = vld [vmem:[%s391_s5 + $0x78] sm:$0xff]  ;;  %v127_v19 = vld [vmem:[%s391_s5 + $0x70] sm:$0xff] }
   0xc   :  { %95 = vmatpush.msra.mxu1 %v84_v5  ;;  %133 = vmatpush.msra.mxu2 %v128_v18  ;;  %v126_v20 = vld [vmem:[%s391_s5 + $0x68] sm:$0xff]  ;;  %v125_v21 = vld [vmem:[%s391_s5 + $0x60] sm:$0xff]  ;;  %v124_v22 = vld [vmem:[%s391_s5 + $0x58] sm:$0xff] }
   0xd   :  { %v123_v23 = vld [vmem:[%s391_s5 + $0x50] sm:$0xff]  ;;  %v122_v24 = vld [vmem:[%s391_s5 + $0x48] sm:$0xff]  ;;  %v121_v25 = vld [vmem:[%s391_s5 + $0x40] sm:$0xff] }
   0xe   :  { %96 = vmatpush.msra.mxu1 %v83_v6  ;;  %134 = vmatpush.msra.mxu2 %v127_v19  ;;  %v120_v26 = vld [vmem:[%s391_s5 + $0x38] sm:$0xff]  ;;  %v119_v27 = vld [vmem:[%s391_s5 + $0x30] sm:$0xff]  ;;  %v118_v28 = vld [vmem:[%s391_s5 + $0x28] sm:$0xff] }
   0xf   :  { %v117_v29 = vld [vmem:[%s391_s5 + $0x20] sm:$0xff]  ;;  %v116_v30 = vld [vmem:[%s391_s5 + $0x18] sm:$0xff]  ;;  %v115_v35 = vld [vmem:[%s391_s5 + $0x10] sm:$0xff] }
  0x10   :  { %97 = vmatpush.msra.mxu1 %v82_v7  ;;  %135 = vmatpush.msra.mxu2 %v126_v20  ;;  %v175_v31 = vld [vmem:[#allocation2] ss:$0 sm:$0xff]  ;;  %v114_v36 = vld [vmem:[%s391_s5 + $0x8] sm:$0xff] }
  0x11   :  { %v113_v37 = vld [vmem:[%s391_s5] sm:$0xff] }
  0x12   :  { %98 = vmatpush.msra.mxu1 %v81_v8  ;;  %136 = vmatpush.msra.mxu2 %v125_v21  ;;  %v176_v38 = vld [vmem:[%s390_s4] ss:$0 sm:$0xff] }
  0x13   :  { %v177_v42 = vld [vmem:[%s392_s6] ss:$0 sm:$0xff] }
  0x14   :  { %99 = vmatpush.msra.mxu1 %v80_v9  ;;  %137 = vmatpush.msra.mxu2 %v124_v22 }
  0x16   :  { %100 = vmatpush.msra.mxu1 %v79_v10  ;;  %138 = vmatpush.msra.mxu2 %v123_v23 }
  0x18   :  { %101 = vmatpush.msra.mxu1 %v78_v11  ;;  %139 = vmatpush.msra.mxu2 %v122_v24 }
  0x1a   :  { %102 = vmatpush.msra.mxu1 %v77_v12  ;;  %140 = vmatpush.msra.mxu2 %v121_v25 }
  0x1c   :  { %103 = vmatpush.msra.mxu1 %v76_v13  ;;  %141 = vmatpush.msra.mxu2 %v120_v26 }
  0x1e   :  { %104 = vmatpush.msra.mxu1 %v75_v14  ;;  %142 = vmatpush.msra.mxu2 %v119_v27 }
  0x20   :  { %105 = vmatpush.msra.mxu1 %v74_v15  ;;  %143 = vmatpush.msra.mxu2 %v118_v28 }
  0x22   :  { %106 = vmatpush.msra.mxu1 %v73_v16  ;;  %144 = vmatpush.msra.mxu2 %v117_v29 }
  0x24   :  { %107 = vmatpush.msra.mxu1 %v72_v17  ;;  %145 = vmatpush.msra.mxu2 %v116_v30 }
  0x26   :  { %146 = vmatpush.msra.mxu2 %v115_v35 }
  0x28   :  { %147 = vmatpush.msra.mxu2 %v114_v36 }
  0x2a   :  { %148 = vmatpush.msra.mxu2 %v113_v37 }
  0x84   :  { %v68_v32 = vpop.f32.mrf.mxu0 }
  0x85   :  { %v69_v33 = vadd.f32 %v175_v31, %v68_v32 }
  0x87   :  { %v71_v34 = vmax.f32 %v69_v33, 0.0 }
  0x89   :  { %108 = vmatmul.f32.vlgmr.msra.gmra.mxu1 %v71_v34 }
 0x106   :  { %v109_v39 = vpop.f32.mrf.mxu1 }
 0x107   :  { %v110_v40 = vadd.f32 %v176_v38, %v109_v39 }
 0x109   :  { %v112_v41 = vmax.f32 %v110_v40, 0.0 }
 0x10b   :  { %149 = vmatmul.f32.vlgmr.msra.gmra.mxu2 %v112_v41 }
 0x18e   :  { %v150_v43 = vpop.f32.mrf.mxu2 }
 0x18f   :  { %v151_v44 = vadd.f32 %v177_v42, %v150_v43 }
 0x191   :  { %154 = vst.msk [vmem:[#allocation5] sm:$0x3] %vm153_vm1, %v151_v44 }
 0x192   :  { %165 = dma.vmem_to_hbm [thread:$0]  %s161_s22, 32, %s163_s25, [#allocation4]  }
 0x193   :  { %228 = dma.done.wait [#allocation4], 32  }
 0x194   :  { %229 = vsyncadd [#allocation4], 4294967264 }
 0x195   :  { %170 = vsyncpa [#allocation3], 1 }
 0x196   :  { %171 = vsyncpa [#allocation4], 1 }

</bundles_post_ra>
